<compile_context>
chip_gen: v7x
topology: tpu7x:2x2x1
jax: 0.10.0
libtpu: 0.0.40
codegen_flags: <defaults>
</compile_context>

<pallas_src>
import jax
import jax.numpy as jnp
from jax.experimental import pallas as pl
from jax.experimental.pallas import tpu as pltpu


# -------------------- batched row gather (init-time only) --------------------

def _make_gather_kernel(rows_per_step):
    def kernel(ids_ref, tbl_hbm, out_ref, buf, sems):
        base = pl.program_id(0) * rows_per_step
        copies = []
        for r in range(rows_per_step):
            rid = ids_ref[base + r]                     # SMEM scalar read
            cp = pltpu.make_async_copy(tbl_hbm.at[rid], buf.at[r], sems.at[r])
            cp.start()
            copies.append(cp)
        for cp in copies:
            cp.wait()
        out_ref[...] = buf[...]
    return kernel


def pallas_gather_rows(ids, table, rows_per_step=8):
    """out[n] = table[ids[n]]; >=8 rows per grid step via manual row DMAs."""
    V, D = table.shape
    shape = ids.shape
    # clamp: nn.Embedding would raise on OOB ids; a data-dependent DMA would
    # silently read an arbitrary row, so bound the ids explicitly.
    ids_flat = jnp.clip(ids.reshape(-1).astype(jnp.int32), 0, V - 1)
    N = ids_flat.shape[0]
    n_steps = -(-N // rows_per_step)
    Np = n_steps * rows_per_step
    if Np != N:
        ids_flat = jnp.concatenate([ids_flat, jnp.zeros((Np - N,), jnp.int32)])
    out = pl.pallas_call(
        _make_gather_kernel(rows_per_step),
        out_shape=jax.ShapeDtypeStruct((Np, D), table.dtype),
        grid_spec=pltpu.PrefetchScalarGridSpec(
            num_scalar_prefetch=1,
            grid=(n_steps,),
            in_specs=[pl.BlockSpec(memory_space=pl.ANY)],        # table in HBM
            out_specs=pl.BlockSpec((rows_per_step, D), lambda g, ids: (g, 0)),
            scratch_shapes=[
                pltpu.VMEM((rows_per_step, D), table.dtype),
                pltpu.SemaphoreType.DMA((rows_per_step,)),
            ],
        ),
        compiler_params=pltpu.CompilerParams(
            dimension_semantics=("arbitrary",)),
    )(ids_flat, table)
    return out[:N].reshape(shape + (D,))


# -------------------- fused prompt + input_ids embedding kernel --------------------

def _make_fused_kernel(TB, T, L, R, pos_user, pos_item, pos_value, pos_flag):
    """One grid step builds TB full rows of [L + T, D] inputs_embeds."""

    def kernel(ids_ref, tok_ids_ref,                       # SMEM scalar prefetch
               tmpl_ref, wu_ref, bu_ref, wv_ref, bv_ref, verb_ref, rat_ref,
               user_hbm, item_hbm, tok_hbm,                # pl.ANY tables
               out_ref,                                    # (TB, L+T, D)
               u_buf, i_buf, f_buf, tok_buf,               # VMEM scratch
               u_sem, i_sem, f_sem, t_sem):                # DMA semaphores
        b0 = pl.program_id(0) * TB

        # ---- issue every gather DMA up front (all SMEM id reads happen before
        #      any .wait(), keeping sst->sld forwarding intact) ----
        row_copies, tok_copies = [], []
        for r in range(TB):
            uid = ids_ref[0, b0 + r]
            iid = ids_ref[1, b0 + r]
            fid = ids_ref[2, b0 + r]
            row_copies.append(pltpu.make_async_copy(
                user_hbm.at[uid], u_buf.at[r], u_sem.at[r]))
            row_copies.append(pltpu.make_async_copy(
                item_hbm.at[iid], i_buf.at[r], i_sem.at[r]))
            row_copies.append(pltpu.make_async_copy(
                tok_hbm.at[fid], f_buf.at[r], f_sem.at[r]))
            for t in range(T):
                tid = tok_ids_ref[b0 + r, t]
                tok_copies.append(pltpu.make_async_copy(
                    tok_hbm.at[tid], tok_buf.at[r, t], t_sem.at[r, t]))
        for cp in row_copies:
            cp.start()
        for cp in tok_copies:
            cp.start()

        # ---- static prompt template rows for every batch row (overlaps DMAs) ----
        tmpl = tmpl_ref[...]                               # (L, D)
        for r in range(TB):
            out_ref[r, 0:L, :] = tmpl

        # ---- wait for the per-batch-row gathers, then the 4 dynamic rows ----
        for cp in row_copies:
            cp.wait()
        u_proj = jnp.dot(u_buf[...], wu_ref[...],
                         preferred_element_type=jnp.float32) + bu_ref[...]
        i_proj = jnp.dot(i_buf[...], wv_ref[...],
                         preferred_element_type=jnp.float32) + bv_ref[...]
        # (rating.unsqueeze(-1) * verbalizer_embeds).sum(1): R is tiny -> VPU FMAs
        rat = rat_ref[...]                                 # (TB, R)
        verb = verb_ref[...]                               # (R, D)
        vals = rat[:, 0:1] * verb[0:1, :]
        for k in range(1, R):
            vals = vals + rat[:, k:k + 1] * verb[k:k + 1, :]
        flag_rows = f_buf[...]                             # (TB, D)
        for r in range(TB):
            out_ref[r, pos_user:pos_user + 1, :] = u_proj[r:r + 1, :]
            out_ref[r, pos_item:pos_item + 1, :] = i_proj[r:r + 1, :]
            out_ref[r, pos_value:pos_value + 1, :] = vals[r:r + 1, :]
            out_ref[r, pos_flag:pos_flag + 1, :] = flag_rows[r:r + 1, :]

        # ---- gathered input_ids token rows -> tail of the fused output ----
        if T > 0:
            for cp in tok_copies:
                cp.wait()
            for r in range(TB):
                out_ref[r, L:L + T, :] = tok_buf[r]

    return kernel


def _choose_tb(B, L, T, D):
    """Batch tile: fits a VMEM budget (v7x-safe) and keeps >=2 grid steps."""
    budget = 24 << 20                       # well under v7x's 64 MiB VMEM
    per_row = (2 * (L + T) + max(T, 1)) * D * 4   # 2x out block + tok_buf (f32)
    cap = max(1, budget // per_row)
    cap = int(min(cap, 128, B))
    best = 1
    for tb in range(1, cap + 1):
        if B % tb == 0 and (B // tb >= 2 or B == 1):
            best = tb
    return best


def pallas_fused_embedding(params, consts, input_ids, user_id, item_id,
                           rating, flag_tok):
    """Single pallas_call producing [B, L_prompt + T, D] inputs_embeds."""
    tmpl = consts["template"]                      # (L, D) f32 (hoisted)
    verb = consts["verb_emb"]                      # (R, D) f32 (hoisted)
    L, D = tmpl.shape
    R = verb.shape[0]
    n_users, H = params["user_emb"].shape
    n_items = params["item_emb"].shape[0]
    V = params["tok_table"].shape[0]
    B = user_id.shape[0]
    T = 0 if input_ids is None else int(input_ids.shape[1])
    L_total = L + T

    TB = _choose_tb(B, L, T, D)
    nb = B // TB

    uid = jnp.clip(user_id.astype(jnp.int32), 0, n_users - 1)
    iid = jnp.clip(item_id.astype(jnp.int32), 0, n_items - 1)
    ftk = jnp.clip(flag_tok.astype(jnp.int32), 0, V - 1)
    ids_packed = jnp.stack([uid, iid, ftk], axis=0)            # one SMEM prefetch
    if T > 0:
        tok_ids = jnp.clip(input_ids.astype(jnp.int32), 0, V - 1)
    else:
        tok_ids = jnp.zeros((B, 1), jnp.int32)                 # never read

    kernel = _make_fused_kernel(TB, T, L, R,
                                consts["pos_user"], consts["pos_item"],
                                consts["pos_value"], consts["pos_flag"])

    # rough VMEM need: double-buffered blocks + scratch, with headroom
    need = 4 * (2 * TB * L_total * D
                + 2 * (L * D + 2 * H * D + 2 * D + R * D + TB * R)
                + TB * (2 * H + D) + TB * max(T, 1) * D)
    vmem_limit = int(min(max(2 * need, 32 << 20), 100 << 20))

    return pl.pallas_call(
        kernel,
        out_shape=jax.ShapeDtypeStruct((B, L_total, D), jnp.float32),
        grid_spec=pltpu.PrefetchScalarGridSpec(
            num_scalar_prefetch=2,
            grid=(nb,),
            in_specs=[
                pl.BlockSpec((L, D), lambda g, ids, tok: (0, 0)),    # template
                pl.BlockSpec((H, D), lambda g, ids, tok: (0, 0)),    # wu
                pl.BlockSpec((1, D), lambda g, ids, tok: (0, 0)),    # bu
                pl.BlockSpec((H, D), lambda g, ids, tok: (0, 0)),    # wv
                pl.BlockSpec((1, D), lambda g, ids, tok: (0, 0)),    # bv
                pl.BlockSpec((R, D), lambda g, ids, tok: (0, 0)),    # verbalizer
                pl.BlockSpec((TB, R), lambda g, ids, tok: (g, 0)),   # rating tile
                pl.BlockSpec(memory_space=pl.ANY),                   # user table
                pl.BlockSpec(memory_space=pl.ANY),                   # item table
                pl.BlockSpec(memory_space=pl.ANY),                   # token table
            ],
            out_specs=pl.BlockSpec((TB, L_total, D),
                                   lambda g, ids, tok: (g, 0, 0)),
            scratch_shapes=[
                pltpu.VMEM((TB, H), jnp.float32),                    # user rows
                pltpu.VMEM((TB, H), jnp.float32),                    # item rows
                pltpu.VMEM((TB, D), jnp.float32),                    # flag rows
                pltpu.VMEM((TB, max(T, 1), D), jnp.float32),         # token rows
                pltpu.SemaphoreType.DMA((TB,)),
                pltpu.SemaphoreType.DMA((TB,)),
                pltpu.SemaphoreType.DMA((TB,)),
                pltpu.SemaphoreType.DMA((TB, max(T, 1))),
            ],
        ),
        compiler_params=pltpu.CompilerParams(
            dimension_semantics=("parallel",),
            vmem_limit_bytes=vmem_limit),
    )(
        ids_packed, tok_ids,
        tmpl, params["wu"], params["bu"], params["wv"], params["bv"],
        verb, rating.astype(jnp.float32),
        params["user_emb"], params["item_emb"], params["tok_table"],
    )


# -------------------- parameter / constant construction --------------------

def make_params(key, user_num, item_num, hidden, llm_hidden, vocab):
    """Deterministic parameter init (xavier-uniform-like for 2-D tensors)."""
    ks = jax.random.split(key, 6)

    def xavier(k, shape):
        fan_in, fan_out = shape[0], shape[1]
        limit = (6.0 / (fan_in + fan_out)) ** 0.5
        return jax.random.uniform(k, shape, jnp.float32, -limit, limit)

    # fixed synthetic "tokenizer" outputs (token id sequences)
    instruction = jnp.arange(10, dtype=jnp.int32)[None, :] % vocab        # [1, 10]
    hp1 = (jnp.arange(4, dtype=jnp.int32) + 20)[None, :] % vocab          # [1, 4]
    hp2 = (jnp.arange(2, dtype=jnp.int32) + 30)[None, :] % vocab          # [1, 2]
    hp3 = (jnp.arange(2, dtype=jnp.int32) + 40)[None, :] % vocab          # [1, 2]
    hp4 = (jnp.arange(3, dtype=jnp.int32) + 50)[None, :] % vocab          # [1, 3]
    hp5 = (jnp.arange(2, dtype=jnp.int32) + 60)[None, :] % vocab          # [1, 2]
    sub_full_words = jnp.array([70, 71], dtype=jnp.int32)                 # [2]
    verbalizer = jnp.array([80, 81, 82, 83, 84], dtype=jnp.int32)         # [5]

    return dict(
        user_emb=xavier(ks[0], (user_num, hidden)),
        item_emb=xavier(ks[1], (item_num, hidden)),
        wu=xavier(ks[2], (hidden, llm_hidden)),
        bu=jnp.zeros((1, llm_hidden), jnp.float32),
        wv=xavier(ks[3], (hidden, llm_hidden)),
        bv=jnp.zeros((1, llm_hidden), jnp.float32),
        # stand-in for model.base_model.model.model.embed_tokens
        tok_table=xavier(ks[4], (vocab, llm_hidden)),
        instruction=instruction, hp1=hp1, hp2=hp2, hp3=hp3, hp4=hp4, hp5=hp5,
        sub_full_words=sub_full_words, verbalizer=verbalizer,
    )


def make_prompt_constants(params):
    """One-time precompute (hoisted out of the forward path): the static prompt
    template (instruction + hard prompts, placeholder rows at the 4 dynamic
    positions) and the verbalizer embeddings."""
    tbl = params["tok_table"]
    li = params["instruction"].shape[1]
    l1 = params["hp1"].shape[1]
    l2 = params["hp2"].shape[1]
    l3 = params["hp3"].shape[1]
    l4 = params["hp4"].shape[1]
    l5 = params["hp5"].shape[1]

    pos_user = li + l1
    pos_item = pos_user + 1 + l2
    pos_value = pos_item + 1 + l3
    pos_flag = pos_value + 1 + l4
    prompt_len = pos_flag + 1 + l5          # == 4 + li + l1 + ... + l5

    dyn = jnp.zeros((1,), jnp.int32)        # placeholder id; overwritten in-kernel
    tmpl_ids = jnp.concatenate([
        params["instruction"][0], params["hp1"][0], dyn,
        params["hp2"][0], dyn, params["hp3"][0], dyn,
        params["hp4"][0], dyn, params["hp5"][0]]).astype(jnp.int32)
    assert tmpl_ids.shape[0] == prompt_len

    template = pallas_gather_rows(tmpl_ids, tbl)              # (L, D)
    verb_emb = pallas_gather_rows(params["verbalizer"], tbl)  # (R, D)
    return dict(template=template, verb_emb=verb_emb,
                pos_user=pos_user, pos_item=pos_item,
                pos_value=pos_value, pos_flag=pos_flag,
                prompt_len=prompt_len)


# -------------------- model wrapper (glue in plain JAX) --------------------

def my_model_get_embedding(params, consts, input_ids, user_id, item_id, rating,
                           curr_flag=None):
    """MyModel.get_embedding (rating path) fused into one pallas_call."""
    B = user_id.shape[0]
    if curr_flag is None:
        flag_tok = jnp.broadcast_to(params["sub_full_words"][1], (B,))
    else:
        flag_tok = params["sub_full_words"][curr_flag]   # per-batch flag token
    return pallas_fused_embedding(params, consts, input_ids, user_id, item_id,
                                  rating, flag_tok)


def my_model_forward(params, consts, input_ids, user_id, item_id, rating):
    inputs_embeds = my_model_get_embedding(params, consts, input_ids,
                                           user_id, item_id, rating)
    # TODO(synk): output = self.model(inputs_embeds=...); softmax(logits[:, -1, :])
    #             requires an external LLM and is not translatable here.
    return inputs_embeds


# -------------------- pure-JAX reference (correctness check) --------------------

def reference_forward(params, input_ids, user_id, item_id, rating):
    tbl = params["tok_table"]
    B = user_id.shape[0]
    user_e = params["user_emb"][user_id] @ params["wu"] + params["bu"]   # [B,D]
    item_e = params["item_emb"][item_id] @ params["wv"] + params["bv"]   # [B,D]
    values = rating @ tbl[params["verbalizer"]]                          # [B,D]
    flag_e = tbl[jnp.broadcast_to(params["sub_full_words"][1], (B,))]    # [B,D]

    def rep(ids):
        e = tbl[ids]
        return jnp.broadcast_to(e[None], (B,) + e.shape)

    prompt = jnp.concatenate([
        rep(params["instruction"][0]), rep(params["hp1"][0]),
        user_e[:, None], rep(params["hp2"][0]), item_e[:, None],
        rep(params["hp3"][0]), values[:, None], rep(params["hp4"][0]),
        flag_e[:, None], rep(params["hp5"][0])], axis=1)
    return jnp.concatenate([prompt, tbl[input_ids]], axis=1)


# -------------------- main --------------------

if __name__ == "__main__":
    USER_NUM, ITEM_NUM = 16, 16
    HIDDEN, LLM_HIDDEN = 32, 128
    VOCAB = 256
    B, T, R = 2, 8, 5

    key = jax.random.PRNGKey(0)
    pkey, k1, k2, k3 = jax.random.split(key, 4)
    params = make_params(pkey, USER_NUM, ITEM_NUM, HIDDEN, LLM_HIDDEN, VOCAB)
    consts = make_prompt_constants(params)     # hoisted one-time precompute

    user_id = jax.random.randint(k1, (B,), 0, USER_NUM, dtype=jnp.int32)
    item_id = jax.random.randint(k2, (B,), 0, ITEM_NUM, dtype=jnp.int32)
    rating = jax.nn.softmax(jax.random.normal(k3, (B, R), jnp.float32), axis=-1)
    input_ids = (jnp.arange(B * T, dtype=jnp.int32).reshape(B, T) + 100) % VOCAB

    out = my_model_forward(params, consts, input_ids, user_id, item_id, rating)
    out = jax.block_until_ready(out)

    ref = reference_forward(params, input_ids, user_id, item_id, rating)
    assert out.shape == (B, consts["prompt_len"] + T, LLM_HIDDEN), out.shape
    assert bool(jnp.all(jnp.isfinite(out)))
    assert bool(jnp.allclose(out, ref, rtol=1e-5, atol=1e-5)), \
        float(jnp.max(jnp.abs(out - ref)))
    print("KERNEL_OK")
</pallas_src>

<mosaic_0001>
module attributes {stable_mosaic.version = 11 : i64} {
  func.func @kernel(%arg0: i32, %arg1: memref<32xi32, #tpu.memory_space<smem>>, %arg2: memref<256x128xf32, #tpu.memory_space<any>>, %arg3: memref<8x128xf32, #tpu.memory_space<vmem>>, %arg4: memref<8x128xf32, #tpu.memory_space<vmem>>, %arg5: memref<8x!tpu.dma_semaphore, #tpu.memory_space<semaphore_mem>>) attributes {dimension_semantics = [#tpu.dimension_semantics<arbitrary>], iteration_bounds = array<i64: 4>, scalar_prefetch = 1 : i64, scratch_operands = 2 : i64, tpu.core_type = #tpu.core_type<tc>, window_params = [{}, {transform_indices = @transform_1, window_bounds = array<i64: 8, 128>}]} {
    %c8_i32 = arith.constant 8 : i32
    %0 = arith.muli %arg0, %c8_i32 : i32
    %c0_i32 = arith.constant 0 : i32
    %1 = arith.addi %0, %c0_i32 : i32
    %2 = arith.index_cast %1 : i32 to index
    %3 = memref.load %arg1[%2] : memref<32xi32, #tpu.memory_space<smem>>
    %c0_i32_0 = arith.constant 0 : i32
    %c0_i32_1 = arith.constant 0 : i32
    %c0_i32_2 = arith.constant 0 : i32
    %4 = tpu.memref_slice %arg2[%3, %c0_i32_2] : memref<256x128xf32, #tpu.memory_space<any>> -> memref<1x128xf32, #tpu.memory_space<any>>
    %5 = tpu.memref_squeeze %4 : memref<1x128xf32, #tpu.memory_space<any>> -> memref<128xf32, #tpu.memory_space<any>>
    %c0_i32_3 = arith.constant 0 : i32
    %6 = tpu.memref_slice %arg4[%c0_i32_0, %c0_i32_3] : memref<8x128xf32, #tpu.memory_space<vmem>> -> memref<1x128xf32, #tpu.memory_space<vmem>>
    %7 = tpu.memref_squeeze %6 : memref<1x128xf32, #tpu.memory_space<vmem>> -> memref<128xf32, #tpu.memory_space<vmem>>
    %8 = tpu.memref_slice %arg5[%c0_i32_1] : memref<8x!tpu.dma_semaphore, #tpu.memory_space<semaphore_mem>> -> memref<1x!tpu.dma_semaphore, #tpu.memory_space<semaphore_mem>>
    %9 = tpu.memref_squeeze %8 : memref<1x!tpu.dma_semaphore, #tpu.memory_space<semaphore_mem>> -> memref<!tpu.dma_semaphore, #tpu.memory_space<semaphore_mem>>
    tpu.enqueue_dma source(%5 : memref<128xf32, #tpu.memory_space<any>>) target(%7 : memref<128xf32, #tpu.memory_space<vmem>>) target_semaphore(%9 : memref<!tpu.dma_semaphore, #tpu.memory_space<semaphore_mem>>)
    %c1_i32 = arith.constant 1 : i32
    %10 = arith.addi %0, %c1_i32 : i32
    %11 = arith.index_cast %10 : i32 to index
    %12 = memref.load %arg1[%11] : memref<32xi32, #tpu.memory_space<smem>>
    %c1_i32_4 = arith.constant 1 : i32
    %c1_i32_5 = arith.constant 1 : i32
    %c0_i32_6 = arith.constant 0 : i32
    %13 = tpu.memref_slice %arg2[%12, %c0_i32_6] : memref<256x128xf32, #tpu.memory_space<any>> -> memref<1x128xf32, #tpu.memory_space<any>>
    %14 = tpu.memref_squeeze %13 : memref<1x128xf32, #tpu.memory_space<any>> -> memref<128xf32, #tpu.memory_space<any>>
    %c0_i32_7 = arith.constant 0 : i32
    %15 = tpu.memref_slice %arg4[%c1_i32_4, %c0_i32_7] : memref<8x128xf32, #tpu.memory_space<vmem>> -> memref<1x128xf32, #tpu.memory_space<vmem>>
    %16 = tpu.memref_squeeze %15 : memref<1x128xf32, #tpu.memory_space<vmem>> -> memref<128xf32, #tpu.memory_space<vmem>>
    %17 = tpu.memref_slice %arg5[%c1_i32_5] : memref<8x!tpu.dma_semaphore, #tpu.memory_space<semaphore_mem>> -> memref<1x!tpu.dma_semaphore, #tpu.memory_space<semaphore_mem>>
    %18 = tpu.memref_squeeze %17 : memref<1x!tpu.dma_semaphore, #tpu.memory_space<semaphore_mem>> -> memref<!tpu.dma_semaphore, #tpu.memory_space<semaphore_mem>>
    tpu.enqueue_dma source(%14 : memref<128xf32, #tpu.memory_space<any>>) target(%16 : memref<128xf32, #tpu.memory_space<vmem>>) target_semaphore(%18 : memref<!tpu.dma_semaphore, #tpu.memory_space<semaphore_mem>>)
    %c2_i32 = arith.constant 2 : i32
    %19 = arith.addi %0, %c2_i32 : i32
    %20 = arith.index_cast %19 : i32 to index
    %21 = memref.load %arg1[%20] : memref<32xi32, #tpu.memory_space<smem>>
    %c2_i32_8 = arith.constant 2 : i32
    %c2_i32_9 = arith.constant 2 : i32
    %c0_i32_10 = arith.constant 0 : i32
    %22 = tpu.memref_slice %arg2[%21, %c0_i32_10] : memref<256x128xf32, #tpu.memory_space<any>> -> memref<1x128xf32, #tpu.memory_space<any>>
    %23 = tpu.memref_squeeze %22 : memref<1x128xf32, #tpu.memory_space<any>> -> memref<128xf32, #tpu.memory_space<any>>
    %c0_i32_11 = arith.constant 0 : i32
    %24 = tpu.memref_slice %arg4[%c2_i32_8, %c0_i32_11] : memref<8x128xf32, #tpu.memory_space<vmem>> -> memref<1x128xf32, #tpu.memory_space<vmem>>
    %25 = tpu.memref_squeeze %24 : memref<1x128xf32, #tpu.memory_space<vmem>> -> memref<128xf32, #tpu.memory_space<vmem>>
    %26 = tpu.memref_slice %arg5[%c2_i32_9] : memref<8x!tpu.dma_semaphore, #tpu.memory_space<semaphore_mem>> -> memref<1x!tpu.dma_semaphore, #tpu.memory_space<semaphore_mem>>
    %27 = tpu.memref_squeeze %26 : memref<1x!tpu.dma_semaphore, #tpu.memory_space<semaphore_mem>> -> memref<!tpu.dma_semaphore, #tpu.memory_space<semaphore_mem>>
    tpu.enqueue_dma source(%23 : memref<128xf32, #tpu.memory_space<any>>) target(%25 : memref<128xf32, #tpu.memory_space<vmem>>) target_semaphore(%27 : memref<!tpu.dma_semaphore, #tpu.memory_space<semaphore_mem>>)
    %c3_i32 = arith.constant 3 : i32
    %28 = arith.addi %0, %c3_i32 : i32
    %29 = arith.index_cast %28 : i32 to index
    %30 = memref.load %arg1[%29] : memref<32xi32, #tpu.memory_space<smem>>
    %c3_i32_12 = arith.constant 3 : i32
    %c3_i32_13 = arith.constant 3 : i32
    %c0_i32_14 = arith.constant 0 : i32
    %31 = tpu.memref_slice %arg2[%30, %c0_i32_14] : memref<256x128xf32, #tpu.memory_space<any>> -> memref<1x128xf32, #tpu.memory_space<any>>
    %32 = tpu.memref_squeeze %31 : memref<1x128xf32, #tpu.memory_space<any>> -> memref<128xf32, #tpu.memory_space<any>>
    %c0_i32_15 = arith.constant 0 : i32
    %33 = tpu.memref_slice %arg4[%c3_i32_12, %c0_i32_15] : memref<8x128xf32, #tpu.memory_space<vmem>> -> memref<1x128xf32, #tpu.memory_space<vmem>>
    %34 = tpu.memref_squeeze %33 : memref<1x128xf32, #tpu.memory_space<vmem>> -> memref<128xf32, #tpu.memory_space<vmem>>
    %35 = tpu.memref_slice %arg5[%c3_i32_13] : memref<8x!tpu.dma_semaphore, #tpu.memory_space<semaphore_mem>> -> memref<1x!tpu.dma_semaphore, #tpu.memory_space<semaphore_mem>>
    %36 = tpu.memref_squeeze %35 : memref<1x!tpu.dma_semaphore, #tpu.memory_space<semaphore_mem>> -> memref<!tpu.dma_semaphore, #tpu.memory_space<semaphore_mem>>
    tpu.enqueue_dma source(%32 : memref<128xf32, #tpu.memory_space<any>>) target(%34 : memref<128xf32, #tpu.memory_space<vmem>>) target_semaphore(%36 : memref<!tpu.dma_semaphore, #tpu.memory_space<semaphore_mem>>)
    %c4_i32 = arith.constant 4 : i32
    %37 = arith.addi %0, %c4_i32 : i32
    %38 = arith.index_cast %37 : i32 to index
    %39 = memref.load %arg1[%38] : memref<32xi32, #tpu.memory_space<smem>>
    %c4_i32_16 = arith.constant 4 : i32
    %c4_i32_17 = arith.constant 4 : i32
    %c0_i32_18 = arith.constant 0 : i32
    %40 = tpu.memref_slice %arg2[%39, %c0_i32_18] : memref<256x128xf32, #tpu.memory_space<any>> -> memref<1x128xf32, #tpu.memory_space<any>>
    %41 = tpu.memref_squeeze %40 : memref<1x128xf32, #tpu.memory_space<any>> -> memref<128xf32, #tpu.memory_space<any>>
    %c0_i32_19 = arith.constant 0 : i32
    %42 = tpu.memref_slice %arg4[%c4_i32_16, %c0_i32_19] : memref<8x128xf32, #tpu.memory_space<vmem>> -> memref<1x128xf32, #tpu.memory_space<vmem>>
    %43 = tpu.memref_squeeze %42 : memref<1x128xf32, #tpu.memory_space<vmem>> -> memref<128xf32, #tpu.memory_space<vmem>>
    %44 = tpu.memref_slice %arg5[%c4_i32_17] : memref<8x!tpu.dma_semaphore, #tpu.memory_space<semaphore_mem>> -> memref<1x!tpu.dma_semaphore, #tpu.memory_space<semaphore_mem>>
    %45 = tpu.memref_squeeze %44 : memref<1x!tpu.dma_semaphore, #tpu.memory_space<semaphore_mem>> -> memref<!tpu.dma_semaphore, #tpu.memory_space<semaphore_mem>>
    tpu.enqueue_dma source(%41 : memref<128xf32, #tpu.memory_space<any>>) target(%43 : memref<128xf32, #tpu.memory_space<vmem>>) target_semaphore(%45 : memref<!tpu.dma_semaphore, #tpu.memory_space<semaphore_mem>>)
    %c5_i32 = arith.constant 5 : i32
    %46 = arith.addi %0, %c5_i32 : i32
    %47 = arith.index_cast %46 : i32 to index
    %48 = memref.load %arg1[%47] : memref<32xi32, #tpu.memory_space<smem>>
    %c5_i32_20 = arith.constant 5 : i32
    %c5_i32_21 = arith.constant 5 : i32
    %c0_i32_22 = arith.constant 0 : i32
    %49 = tpu.memref_slice %arg2[%48, %c0_i32_22] : memref<256x128xf32, #tpu.memory_space<any>> -> memref<1x128xf32, #tpu.memory_space<any>>
    %50 = tpu.memref_squeeze %49 : memref<1x128xf32, #tpu.memory_space<any>> -> memref<128xf32, #tpu.memory_space<any>>
    %c0_i32_23 = arith.constant 0 : i32
    %51 = tpu.memref_slice %arg4[%c5_i32_20, %c0_i32_23] : memref<8x128xf32, #tpu.memory_space<vmem>> -> memref<1x128xf32, #tpu.memory_space<vmem>>
    %52 = tpu.memref_squeeze %51 : memref<1x128xf32, #tpu.memory_space<vmem>> -> memref<128xf32, #tpu.memory_space<vmem>>
    %53 = tpu.memref_slice %arg5[%c5_i32_21] : memref<8x!tpu.dma_semaphore, #tpu.memory_space<semaphore_mem>> -> memref<1x!tpu.dma_semaphore, #tpu.memory_space<semaphore_mem>>
    %54 = tpu.memref_squeeze %53 : memref<1x!tpu.dma_semaphore, #tpu.memory_space<semaphore_mem>> -> memref<!tpu.dma_semaphore, #tpu.memory_space<semaphore_mem>>
    tpu.enqueue_dma source(%50 : memref<128xf32, #tpu.memory_space<any>>) target(%52 : memref<128xf32, #tpu.memory_space<vmem>>) target_semaphore(%54 : memref<!tpu.dma_semaphore, #tpu.memory_space<semaphore_mem>>)
    %c6_i32 = arith.constant 6 : i32
    %55 = arith.addi %0, %c6_i32 : i32
    %56 = arith.index_cast %55 : i32 to index
    %57 = memref.load %arg1[%56] : memref<32xi32, #tpu.memory_space<smem>>
    %c6_i32_24 = arith.constant 6 : i32
    %c6_i32_25 = arith.constant 6 : i32
    %c0_i32_26 = arith.constant 0 : i32
    %58 = tpu.memref_slice %arg2[%57, %c0_i32_26] : memref<256x128xf32, #tpu.memory_space<any>> -> memref<1x128xf32, #tpu.memory_space<any>>
    %59 = tpu.memref_squeeze %58 : memref<1x128xf32, #tpu.memory_space<any>> -> memref<128xf32, #tpu.memory_space<any>>
    %c0_i32_27 = arith.constant 0 : i32
    %60 = tpu.memref_slice %arg4[%c6_i32_24, %c0_i32_27] : memref<8x128xf32, #tpu.memory_space<vmem>> -> memref<1x128xf32, #tpu.memory_space<vmem>>
    %61 = tpu.memref_squeeze %60 : memref<1x128xf32, #tpu.memory_space<vmem>> -> memref<128xf32, #tpu.memory_space<vmem>>
    %62 = tpu.memref_slice %arg5[%c6_i32_25] : memref<8x!tpu.dma_semaphore, #tpu.memory_space<semaphore_mem>> -> memref<1x!tpu.dma_semaphore, #tpu.memory_space<semaphore_mem>>
    %63 = tpu.memref_squeeze %62 : memref<1x!tpu.dma_semaphore, #tpu.memory_space<semaphore_mem>> -> memref<!tpu.dma_semaphore, #tpu.memory_space<semaphore_mem>>
    tpu.enqueue_dma source(%59 : memref<128xf32, #tpu.memory_space<any>>) target(%61 : memref<128xf32, #tpu.memory_space<vmem>>) target_semaphore(%63 : memref<!tpu.dma_semaphore, #tpu.memory_space<semaphore_mem>>)
    %c7_i32 = arith.constant 7 : i32
    %64 = arith.addi %0, %c7_i32 : i32
    %65 = arith.index_cast %64 : i32 to index
    %66 = memref.load %arg1[%65] : memref<32xi32, #tpu.memory_space<smem>>
    %c7_i32_28 = arith.constant 7 : i32
    %c7_i32_29 = arith.constant 7 : i32
    %c0_i32_30 = arith.constant 0 : i32
    %67 = tpu.memref_slice %arg2[%66, %c0_i32_30] : memref<256x128xf32, #tpu.memory_space<any>> -> memref<1x128xf32, #tpu.memory_space<any>>
    %68 = tpu.memref_squeeze %67 : memref<1x128xf32, #tpu.memory_space<any>> -> memref<128xf32, #tpu.memory_space<any>>
    %c0_i32_31 = arith.constant 0 : i32
    %69 = tpu.memref_slice %arg4[%c7_i32_28, %c0_i32_31] : memref<8x128xf32, #tpu.memory_space<vmem>> -> memref<1x128xf32, #tpu.memory_space<vmem>>
    %70 = tpu.memref_squeeze %69 : memref<1x128xf32, #tpu.memory_space<vmem>> -> memref<128xf32, #tpu.memory_space<vmem>>
    %71 = tpu.memref_slice %arg5[%c7_i32_29] : memref<8x!tpu.dma_semaphore, #tpu.memory_space<semaphore_mem>> -> memref<1x!tpu.dma_semaphore, #tpu.memory_space<semaphore_mem>>
    %72 = tpu.memref_squeeze %71 : memref<1x!tpu.dma_semaphore, #tpu.memory_space<semaphore_mem>> -> memref<!tpu.dma_semaphore, #tpu.memory_space<semaphore_mem>>
    tpu.enqueue_dma source(%68 : memref<128xf32, #tpu.memory_space<any>>) target(%70 : memref<128xf32, #tpu.memory_space<vmem>>) target_semaphore(%72 : memref<!tpu.dma_semaphore, #tpu.memory_space<semaphore_mem>>)
    %c0_i32_32 = arith.constant 0 : i32
    %c0_i32_33 = arith.constant 0 : i32
    %c0_i32_34 = arith.constant 0 : i32
    %73 = tpu.memref_slice %arg2[%3, %c0_i32_34] : memref<256x128xf32, #tpu.memory_space<any>> -> memref<1x128xf32, #tpu.memory_space<any>>
    %74 = tpu.memref_squeeze %73 : memref<1x128xf32, #tpu.memory_space<any>> -> memref<128xf32, #tpu.memory_space<any>>
    %c0_i32_35 = arith.constant 0 : i32
    %75 = tpu.memref_slice %arg4[%c0_i32_32, %c0_i32_35] : memref<8x128xf32, #tpu.memory_space<vmem>> -> memref<1x128xf32, #tpu.memory_space<vmem>>
    %76 = tpu.memref_squeeze %75 : memref<1x128xf32, #tpu.memory_space<vmem>> -> memref<128xf32, #tpu.memory_space<vmem>>
    %77 = tpu.memref_slice %arg5[%c0_i32_33] : memref<8x!tpu.dma_semaphore, #tpu.memory_space<semaphore_mem>> -> memref<1x!tpu.dma_semaphore, #tpu.memory_space<semaphore_mem>>
    %78 = tpu.memref_squeeze %77 : memref<1x!tpu.dma_semaphore, #tpu.memory_space<semaphore_mem>> -> memref<!tpu.dma_semaphore, #tpu.memory_space<semaphore_mem>>
    tpu.wait_dma2 semaphore(%78 : memref<!tpu.dma_semaphore, #tpu.memory_space<semaphore_mem>>) src(%74 : memref<128xf32, #tpu.memory_space<any>>) dst(%76 : memref<128xf32, #tpu.memory_space<vmem>>)
    %c1_i32_36 = arith.constant 1 : i32
    %c1_i32_37 = arith.constant 1 : i32
    %c0_i32_38 = arith.constant 0 : i32
    %79 = tpu.memref_slice %arg2[%12, %c0_i32_38] : memref<256x128xf32, #tpu.memory_space<any>> -> memref<1x128xf32, #tpu.memory_space<any>>
    %80 = tpu.memref_squeeze %79 : memref<1x128xf32, #tpu.memory_space<any>> -> memref<128xf32, #tpu.memory_space<any>>
    %c0_i32_39 = arith.constant 0 : i32
    %81 = tpu.memref_slice %arg4[%c1_i32_36, %c0_i32_39] : memref<8x128xf32, #tpu.memory_space<vmem>> -> memref<1x128xf32, #tpu.memory_space<vmem>>
    %82 = tpu.memref_squeeze %81 : memref<1x128xf32, #tpu.memory_space<vmem>> -> memref<128xf32, #tpu.memory_space<vmem>>
    %83 = tpu.memref_slice %arg5[%c1_i32_37] : memref<8x!tpu.dma_semaphore, #tpu.memory_space<semaphore_mem>> -> memref<1x!tpu.dma_semaphore, #tpu.memory_space<semaphore_mem>>
    %84 = tpu.memref_squeeze %83 : memref<1x!tpu.dma_semaphore, #tpu.memory_space<semaphore_mem>> -> memref<!tpu.dma_semaphore, #tpu.memory_space<semaphore_mem>>
    tpu.wait_dma2 semaphore(%84 : memref<!tpu.dma_semaphore, #tpu.memory_space<semaphore_mem>>) src(%80 : memref<128xf32, #tpu.memory_space<any>>) dst(%82 : memref<128xf32, #tpu.memory_space<vmem>>)
    %c2_i32_40 = arith.constant 2 : i32
    %c2_i32_41 = arith.constant 2 : i32
    %c0_i32_42 = arith.constant 0 : i32
    %85 = tpu.memref_slice %arg2[%21, %c0_i32_42] : memref<256x128xf32, #tpu.memory_space<any>> -> memref<1x128xf32, #tpu.memory_space<any>>
    %86 = tpu.memref_squeeze %85 : memref<1x128xf32, #tpu.memory_space<any>> -> memref<128xf32, #tpu.memory_space<any>>
    %c0_i32_43 = arith.constant 0 : i32
    %87 = tpu.memref_slice %arg4[%c2_i32_40, %c0_i32_43] : memref<8x128xf32, #tpu.memory_space<vmem>> -> memref<1x128xf32, #tpu.memory_space<vmem>>
    %88 = tpu.memref_squeeze %87 : memref<1x128xf32, #tpu.memory_space<vmem>> -> memref<128xf32, #tpu.memory_space<vmem>>
    %89 = tpu.memref_slice %arg5[%c2_i32_41] : memref<8x!tpu.dma_semaphore, #tpu.memory_space<semaphore_mem>> -> memref<1x!tpu.dma_semaphore, #tpu.memory_space<semaphore_mem>>
    %90 = tpu.memref_squeeze %89 : memref<1x!tpu.dma_semaphore, #tpu.memory_space<semaphore_mem>> -> memref<!tpu.dma_semaphore, #tpu.memory_space<semaphore_mem>>
    tpu.wait_dma2 semaphore(%90 : memref<!tpu.dma_semaphore, #tpu.memory_space<semaphore_mem>>) src(%86 : memref<128xf32, #tpu.memory_space<any>>) dst(%88 : memref<128xf32, #tpu.memory_space<vmem>>)
    %c3_i32_44 = arith.constant 3 : i32
    %c3_i32_45 = arith.constant 3 : i32
    %c0_i32_46 = arith.constant 0 : i32
    %91 = tpu.memref_slice %arg2[%30, %c0_i32_46] : memref<256x128xf32, #tpu.memory_space<any>> -> memref<1x128xf32, #tpu.memory_space<any>>
    %92 = tpu.memref_squeeze %91 : memref<1x128xf32, #tpu.memory_space<any>> -> memref<128xf32, #tpu.memory_space<any>>
    %c0_i32_47 = arith.constant 0 : i32
    %93 = tpu.memref_slice %arg4[%c3_i32_44, %c0_i32_47] : memref<8x128xf32, #tpu.memory_space<vmem>> -> memref<1x128xf32, #tpu.memory_space<vmem>>
    %94 = tpu.memref_squeeze %93 : memref<1x128xf32, #tpu.memory_space<vmem>> -> memref<128xf32, #tpu.memory_space<vmem>>
    %95 = tpu.memref_slice %arg5[%c3_i32_45] : memref<8x!tpu.dma_semaphore, #tpu.memory_space<semaphore_mem>> -> memref<1x!tpu.dma_semaphore, #tpu.memory_space<semaphore_mem>>
    %96 = tpu.memref_squeeze %95 : memref<1x!tpu.dma_semaphore, #tpu.memory_space<semaphore_mem>> -> memref<!tpu.dma_semaphore, #tpu.memory_space<semaphore_mem>>
    tpu.wait_dma2 semaphore(%96 : memref<!tpu.dma_semaphore, #tpu.memory_space<semaphore_mem>>) src(%92 : memref<128xf32, #tpu.memory_space<any>>) dst(%94 : memref<128xf32, #tpu.memory_space<vmem>>)
    %c4_i32_48 = arith.constant 4 : i32
    %c4_i32_49 = arith.constant 4 : i32
    %c0_i32_50 = arith.constant 0 : i32
    %97 = tpu.memref_slice %arg2[%39, %c0_i32_50] : memref<256x128xf32, #tpu.memory_space<any>> -> memref<1x128xf32, #tpu.memory_space<any>>
    %98 = tpu.memref_squeeze %97 : memref<1x128xf32, #tpu.memory_space<any>> -> memref<128xf32, #tpu.memory_space<any>>
    %c0_i32_51 = arith.constant 0 : i32
    %99 = tpu.memref_slice %arg4[%c4_i32_48, %c0_i32_51] : memref<8x128xf32, #tpu.memory_space<vmem>> -> memref<1x128xf32, #tpu.memory_space<vmem>>
    %100 = tpu.memref_squeeze %99 : memref<1x128xf32, #tpu.memory_space<vmem>> -> memref<128xf32, #tpu.memory_space<vmem>>
    %101 = tpu.memref_slice %arg5[%c4_i32_49] : memref<8x!tpu.dma_semaphore, #tpu.memory_space<semaphore_mem>> -> memref<1x!tpu.dma_semaphore, #tpu.memory_space<semaphore_mem>>
    %102 = tpu.memref_squeeze %101 : memref<1x!tpu.dma_semaphore, #tpu.memory_space<semaphore_mem>> -> memref<!tpu.dma_semaphore, #tpu.memory_space<semaphore_mem>>
    tpu.wait_dma2 semaphore(%102 : memref<!tpu.dma_semaphore, #tpu.memory_space<semaphore_mem>>) src(%98 : memref<128xf32, #tpu.memory_space<any>>) dst(%100 : memref<128xf32, #tpu.memory_space<vmem>>)
    %c5_i32_52 = arith.constant 5 : i32
    %c5_i32_53 = arith.constant 5 : i32
    %c0_i32_54 = arith.constant 0 : i32
    %103 = tpu.memref_slice %arg2[%48, %c0_i32_54] : memref<256x128xf32, #tpu.memory_space<any>> -> memref<1x128xf32, #tpu.memory_space<any>>
    %104 = tpu.memref_squeeze %103 : memref<1x128xf32, #tpu.memory_space<any>> -> memref<128xf32, #tpu.memory_space<any>>
    %c0_i32_55 = arith.constant 0 : i32
    %105 = tpu.memref_slice %arg4[%c5_i32_52, %c0_i32_55] : memref<8x128xf32, #tpu.memory_space<vmem>> -> memref<1x128xf32, #tpu.memory_space<vmem>>
    %106 = tpu.memref_squeeze %105 : memref<1x128xf32, #tpu.memory_space<vmem>> -> memref<128xf32, #tpu.memory_space<vmem>>
    %107 = tpu.memref_slice %arg5[%c5_i32_53] : memref<8x!tpu.dma_semaphore, #tpu.memory_space<semaphore_mem>> -> memref<1x!tpu.dma_semaphore, #tpu.memory_space<semaphore_mem>>
    %108 = tpu.memref_squeeze %107 : memref<1x!tpu.dma_semaphore, #tpu.memory_space<semaphore_mem>> -> memref<!tpu.dma_semaphore, #tpu.memory_space<semaphore_mem>>
    tpu.wait_dma2 semaphore(%108 : memref<!tpu.dma_semaphore, #tpu.memory_space<semaphore_mem>>) src(%104 : memref<128xf32, #tpu.memory_space<any>>) dst(%106 : memref<128xf32, #tpu.memory_space<vmem>>)
    %c6_i32_56 = arith.constant 6 : i32
    %c6_i32_57 = arith.constant 6 : i32
    %c0_i32_58 = arith.constant 0 : i32
    %109 = tpu.memref_slice %arg2[%57, %c0_i32_58] : memref<256x128xf32, #tpu.memory_space<any>> -> memref<1x128xf32, #tpu.memory_space<any>>
    %110 = tpu.memref_squeeze %109 : memref<1x128xf32, #tpu.memory_space<any>> -> memref<128xf32, #tpu.memory_space<any>>
    %c0_i32_59 = arith.constant 0 : i32
    %111 = tpu.memref_slice %arg4[%c6_i32_56, %c0_i32_59] : memref<8x128xf32, #tpu.memory_space<vmem>> -> memref<1x128xf32, #tpu.memory_space<vmem>>
    %112 = tpu.memref_squeeze %111 : memref<1x128xf32, #tpu.memory_space<vmem>> -> memref<128xf32, #tpu.memory_space<vmem>>
    %113 = tpu.memref_slice %arg5[%c6_i32_57] : memref<8x!tpu.dma_semaphore, #tpu.memory_space<semaphore_mem>> -> memref<1x!tpu.dma_semaphore, #tpu.memory_space<semaphore_mem>>
    %114 = tpu.memref_squeeze %113 : memref<1x!tpu.dma_semaphore, #tpu.memory_space<semaphore_mem>> -> memref<!tpu.dma_semaphore, #tpu.memory_space<semaphore_mem>>
    tpu.wait_dma2 semaphore(%114 : memref<!tpu.dma_semaphore, #tpu.memory_space<semaphore_mem>>) src(%110 : memref<128xf32, #tpu.memory_space<any>>) dst(%112 : memref<128xf32, #tpu.memory_space<vmem>>)
    %c7_i32_60 = arith.constant 7 : i32
    %c7_i32_61 = arith.constant 7 : i32
    %c0_i32_62 = arith.constant 0 : i32
    %115 = tpu.memref_slice %arg2[%66, %c0_i32_62] : memref<256x128xf32, #tpu.memory_space<any>> -> memref<1x128xf32, #tpu.memory_space<any>>
    %116 = tpu.memref_squeeze %115 : memref<1x128xf32, #tpu.memory_space<any>> -> memref<128xf32, #tpu.memory_space<any>>
    %c0_i32_63 = arith.constant 0 : i32
    %117 = tpu.memref_slice %arg4[%c7_i32_60, %c0_i32_63] : memref<8x128xf32, #tpu.memory_space<vmem>> -> memref<1x128xf32, #tpu.memory_space<vmem>>
    %118 = tpu.memref_squeeze %117 : memref<1x128xf32, #tpu.memory_space<vmem>> -> memref<128xf32, #tpu.memory_space<vmem>>
    %119 = tpu.memref_slice %arg5[%c7_i32_61] : memref<8x!tpu.dma_semaphore, #tpu.memory_space<semaphore_mem>> -> memref<1x!tpu.dma_semaphore, #tpu.memory_space<semaphore_mem>>
    %120 = tpu.memref_squeeze %119 : memref<1x!tpu.dma_semaphore, #tpu.memory_space<semaphore_mem>> -> memref<!tpu.dma_semaphore, #tpu.memory_space<semaphore_mem>>
    tpu.wait_dma2 semaphore(%120 : memref<!tpu.dma_semaphore, #tpu.memory_space<semaphore_mem>>) src(%116 : memref<128xf32, #tpu.memory_space<any>>) dst(%118 : memref<128xf32, #tpu.memory_space<vmem>>)
    %c0 = arith.constant 0 : index
    %c0_64 = arith.constant 0 : index
    %121 = vector.load %arg4[%c0, %c0_64] : memref<8x128xf32, #tpu.memory_space<vmem>>, vector<8x128xf32>
    %c0_65 = arith.constant 0 : index
    %c0_66 = arith.constant 0 : index
    %122 = vector.load %arg3[%c0_65, %c0_66] : memref<8x128xf32, #tpu.memory_space<vmem>>, vector<8x128xf32>
    tpu.vector_store %arg3[%c0_65, %c0_66], %121 {strides = array<i32>} : memref<8x128xf32, #tpu.memory_space<vmem>>, vector<8x128xf32>,
    return
  }
  func.func @transform_1(%arg0: i32, %arg1: memref<32xi32, #tpu.memory_space<smem>>) -> (i32, i32) {
    %c0_i32 = arith.constant 0 : i32
    %c0_i32_0 = arith.constant 0 : i32
    return %arg0, %c0_i32 : i32, i32
  }
}

</mosaic_0001>

<bundles_post_ra>
// kernel: tpu_custom_call.1
= control target key start
LH: loop header
LB: loop body
LE: loop exit
PB: predicated region body
PF: predicated region fallthrough
CT: control target
= control target key end

     0   :  { %s925_s0 = inlined_call_operand.hbm [shape: s32[32], index: 0, kind: input, shape index: {}]   ;;  %s926_s1 = inlined_call_operand.hbm [shape: f32[256,128], index: 1, kind: input, shape index: {}]   ;;  %s927_s2 = inlined_call_operand.hbm [shape: f32[32,128], index: 2, kind: output, shape index: {}]  }
   0x1   :  { %s397_s11 = scalar_lea.hbm %s925_s0, 16 }
   0x2   :  { %p398_p0 = scmp.ne.s32.totalorder %s925_s0, %s397_s11  ;;  %p401_p1 = scmp.lt.u32.totalorder %s397_s11, %s925_s0 }
   0x4   :  { %p403_p2 = pnand %p401_p1, %p398_p0 }
   0x6   :  { %406 = shalt.err (!%p403_p2)  }
   0x7   :  { %s673_s16 = smov [#allocation5]  }
   0x8   :  { %8 = dma.hbm_to_smem %s925_s0, 16, %s673_s16, [#allocation4] }
   0x9   :  { %639 = dma.done.wait [#allocation4], 16 }
   0xa   :  { %640 = vsyncadd [#allocation4], 4294967280 }
   0xb   :  { %10 = sfence }
   0xc   :  { %11 = vsyncpa [#allocation7], 0 }
   0xd   :  { %13 = vsyncpa [#allocation7 + $0x1], 0  ;;  %s710_s19 = smov 0   ;;  %s712_s20 = smov 0  }
   0xe   :  { %s714_s21 = smov 0  }
   0xf LB: > { %s332_s0 = sadd.s32 4294967295, %s671_s21   ;;  %s727_s22 = sadd.s32 1, %s671_s21   ;;  %s671_s21 = sphi %s714_s21, %s932_s21   ;;  %s667_s20 = sphi %s712_s20, %s931_s20   ;;  %s663_s19 = sphi %s710_s19, %s930_s19  }
  0x10   : > { %s22_s23 = ssub.s32 %s671_s21, %s727_s22  ;;  %s25_s24 = sadd.s32 1, %s667_s20 }
  0x11   : > { %p23_p3 = scmp.eq.s32.totalorder %s22_s23, 0  ;;  %p333_p4 = scmp.ne.s32.totalorder %s22_s23, 0 }
  0x12   : > { %p29_p5 = scmp.eq.s32.totalorder %s671_s21, 3  ;;  %p34_p6 = scmp.ne.s32.totalorder %s667_s20, %s663_s19 }
  0x13   : > { %s736_s25 = scalar_select %p23_p3, %s667_s20, %s25_s24  }
  0x14   : > { %p738_p7 = por %p333_p4, %p29_p5  ;;  %p35_p8 = scmp.eq.s32.totalorder %s332_s0, 3 }
  0x15   : > { %p334_p10 = scmp.ge.s32.totalorder %s671_s21, 4 }
  0x16   : > { %p742_p9 = por %p35_p8, %p34_p6  ;;  %s49_s28 = sand.u32 (!%p334_p10), 1, %s667_s20  }
  0x17   : > { %44 = sbr.rel (%p334_p10) target bundleno = 244 (0xf4), region = 12  ;;  %s749_s29 = sshll.u32 (!%p334_p10), %s671_s21, 3 }
  0x18   : > { %s753_s30 = sshll.u32 (!%p334_p10), %s49_s28, 3  ;;  %s53_s3 = sld [smem:[#allocation5 + %s749_s29]] (!%p334_p10) }
  0x19   : > { %s674_s4 = smov (!%p334_p10), [#allocation2]   ;;  %s67_s6 = sadd.s32 (!%p334_p10), 1, %s749_s29 }
  0x1a   : > { %s63_s5 = sshll.u32 (!%p334_p10), %s674_s4, 4  ;;  %s759_s7 = sld [smem:[#allocation5 + %s67_s6]] (!%p334_p10)  ;;  %s757_s5 = int_to_ptr.vmem [resolvable:$true] %s63_s5 }
  0x1b   : > { %s84_s8 = sadd.s32 (!%p334_p10), 2, %s749_s29  ;;  %s675_s9 = smov (!%p334_p10), [#allocation2 + $0x1]  }
  0x1c   : > { %s80_s10 = sshll.u32 (!%p334_p10), %s675_s9, 4  ;;  %s762_s11 = sld [smem:[#allocation5 + %s84_s8]] (!%p334_p10)  ;;  %s764_s10 = int_to_ptr.vmem [resolvable:$true] %s80_s10 }
  0x1d   : > { %s772_s0 = scalar_lea.hbm (!%p334_p10), %s926_s1, 4096 }
  0x1e   : > { %s337_s12 = sshll.u32 %s53_s3, 4 }
  0x1f   : > { %s55_s15 = scalar_lea.hbm %s926_s1, %s337_s12 }
  0x20   : > { %s407_s16 = scalar_lea.hbm %s55_s15, 16  ;;  %p410_p12 = scmp.lt.u32.totalorder %s55_s15, %s926_s1 }
  0x21   : > { %p408_p11 = scmp.ne.s32.totalorder %s55_s15, %s407_s16  ;;  %p411_p13 = scmp.lt.u32.totalorder %s772_s0, %s407_s16 }
  0x22   : > { %p413_p1 = scmp.lt.u32.totalorder %s407_s16, %s55_s15 }
  0x23   : > { %p412_p0 = por %p411_p13, %p410_p12 }
  0x25   : > { %p414_p2 = por %p413_p1, %p412_p0 }
  0x27   : > { %p415_p3 = pnand %p414_p2, %p408_p11 }
  0x29   : > { %418 = shalt.err (!%p415_p3)  }
  0x2a   : > { %s419_s3 = scalar_lea.vmem %s757_s5, 16  ;;  %s781_s4 = scalar_lea.vmem %s757_s5, 128 }
  0x2b   : > { %p420_p4 = scmp.ne.s32.totalorder %s757_s5, %s419_s3  ;;  %p424_p5 = scmp.lt.s32.totalorder %s757_s5, %s757_s5 }
  0x2c   : > { %p425_p6 = scmp.lt.s32.totalorder %s781_s4, %s419_s3 }
  0x2e   : > { %p426_p8 = por %p425_p6, %p424_p5 }
  0x30   : > { %p427_p10 = pnand %p426_p8, %p420_p4 }
  0x32   : > { %430 = shalt.err (!%p427_p10)  }
  0x33   : > { %66 = dma.hbm_to_vmem [thread:$0]  %s55_s15, 16, %s757_s5, [#allocation3] }
  0x34   : > { %s338_s6 = sshll.u32 %s759_s7, 4  ;;  %s676_s8 = smov [#allocation2 + $0x2]  }
  0x35   : > { %s97_s9 = sshll.u32 %s676_s8, 4  ;;  %s70_s14 = scalar_lea.hbm %s926_s1, %s338_s6  ;;  %s791_s9 = int_to_ptr.vmem [resolvable:$true] %s97_s9 }
  0x36   : > { %s431_s16 = scalar_lea.hbm %s70_s14, 16  ;;  %p434_p12 = scmp.lt.u32.totalorder %s70_s14, %s926_s1 }
  0x37   : > { %p432_p11 = scmp.ne.s32.totalorder %s70_s14, %s431_s16  ;;  %p435_p13 = scmp.lt.u32.totalorder %s772_s0, %s431_s16 }
  0x38   : > { %p437_p1 = scmp.lt.u32.totalorder %s431_s16, %s70_s14 }
  0x39   : > { %p436_p0 = por %p435_p13, %p434_p12 }
  0x3b   : > { %p438_p2 = por %p437_p1, %p436_p0 }
  0x3d   : > { %p439_p3 = pnand %p438_p2, %p432_p11 }
  0x3f   : > { %442 = shalt.err (!%p439_p3)  }
  0x40   : > { %s443_s7 = scalar_lea.vmem %s764_s10, 16  ;;  %p448_p5 = scmp.lt.s32.totalorder %s764_s10, %s757_s5 }
  0x41   : > { %p444_p4 = scmp.ne.s32.totalorder %s764_s10, %s443_s7  ;;  %p449_p6 = scmp.lt.s32.totalorder %s781_s4, %s443_s7 }
  0x43   : > { %p450_p8 = por %p449_p6, %p448_p5 }
  0x45   : > { %p451_p10 = pnand %p450_p8, %p444_p4 }
  0x47   : > { %454 = shalt.err (!%p451_p10)  }
  0x48   : > { %83 = dma.hbm_to_vmem [thread:$0]  %s70_s14, 16, %s764_s10, [#allocation3 + $0x1] }
  0x49   : > { %s339_s15 = sshll.u32 %s762_s11, 4  ;;  %s101_s23 = sadd.s32 3, %s749_s29 }
  0x4a   : > { %s87_s6 = scalar_lea.hbm %s926_s1, %s339_s15  ;;  %s808_s8 = sld [smem:[#allocation5 + %s101_s23]] }
  0x4b   : > { %s455_s12 = scalar_lea.hbm %s87_s6, 16  ;;  %p458_p12 = scmp.lt.u32.totalorder %s87_s6, %s926_s1 }
  0x4c   : > { %p456_p11 = scmp.ne.s32.totalorder %s87_s6, %s455_s12  ;;  %p459_p13 = scmp.lt.u32.totalorder %s772_s0, %s455_s12 }
  0x4d   : > { %p461_p1 = scmp.lt.u32.totalorder %s455_s12, %s87_s6 }
  0x4e   : > { %p460_p0 = por %p459_p13, %p458_p12 }
  0x50   : > { %p462_p2 = por %p461_p1, %p460_p0 }
  0x52   : > { %p463_p3 = pnand %p462_p2, %p456_p11 }
  0x54   : > { %466 = shalt.err (!%p463_p3)  }
  0x55   : > { %s467_s10 = scalar_lea.vmem %s791_s9, 16  ;;  %p472_p5 = scmp.lt.s32.totalorder %s791_s9, %s757_s5 }
  0x56   : > { %p468_p4 = scmp.ne.s32.totalorder %s791_s9, %s467_s10  ;;  %p473_p6 = scmp.lt.s32.totalorder %s781_s4, %s467_s10 }
  0x58   : > { %p474_p8 = por %p473_p6, %p472_p5 }
  0x5a   : > { %p475_p10 = pnand %p474_p8, %p468_p4 }
  0x5c   : > { %478 = shalt.err (!%p475_p10)  }
  0x5d   : > { %100 = dma.hbm_to_vmem [thread:$0]  %s87_s6, 16, %s791_s9, [#allocation3 + $0x2] }
  0x5e   : > { %s118_s11 = sadd.s32 4, %s749_s29  ;;  %s677_s14 = smov [#allocation2 + $0x3]  }
  0x5f   : > { %s114_s17 = sshll.u32 %s677_s14, 4  ;;  %s119_s18 = sld [smem:[#allocation5 + %s118_s11]]  ;;  %s115_s17 = int_to_ptr.vmem [resolvable:$true] %s114_s17 }
  0x60   : > { %s678_s7 = smov [#allocation2 + $0x4]   ;;  %s135_s23 = sadd.s32 5, %s749_s29 }
  0x61   : > { %s131_s15 = sshll.u32 %s678_s7, 4  ;;  %s340_s24 = sshll.u32 %s808_s8, 4  ;;  %s823_s15 = int_to_ptr.vmem [resolvable:$true] %s131_s15 }
  0x62   : > { %s104_s13 = scalar_lea.hbm %s926_s1, %s340_s24  ;;  %s828_s16 = sld [smem:[#allocation5 + %s135_s23]] }
  0x63   : > { %s479_s10 = scalar_lea.hbm %s104_s13, 16  ;;  %p482_p12 = scmp.lt.u32.totalorder %s104_s13, %s926_s1 }
  0x64   : > { %p480_p11 = scmp.ne.s32.totalorder %s104_s13, %s479_s10  ;;  %p483_p13 = scmp.lt.u32.totalorder %s772_s0, %s479_s10 }
  0x65   : > { %p485_p1 = scmp.lt.u32.totalorder %s479_s10, %s104_s13 }
  0x66   : > { %p484_p0 = por %p483_p13, %p482_p12 }
  0x68   : > { %p486_p2 = por %p485_p1, %p484_p0 }
  0x6a   : > { %p487_p3 = pnand %p486_p2, %p480_p11 }
  0x6c   : > { %490 = shalt.err (!%p487_p3)  }
  0x6d   : > { %s491_s8 = scalar_lea.vmem %s115_s17, 16  ;;  %p496_p5 = scmp.lt.s32.totalorder %s115_s17, %s757_s5 }
  0x6e   : > { %p492_p4 = scmp.ne.s32.totalorder %s115_s17, %s491_s8  ;;  %p497_p6 = scmp.lt.s32.totalorder %s781_s4, %s491_s8 }
  0x70   : > { %p498_p8 = por %p497_p6, %p496_p5 }
  0x72   : > { %p499_p10 = pnand %p498_p8, %p492_p4 }
  0x74   : > { %502 = shalt.err (!%p499_p10)  }
  0x75   : > { %117 = dma.hbm_to_vmem [thread:$0]  %s104_s13, 16, %s115_s17, [#allocation3 + $0x3] }
  0x76   : > { %s341_s11 = sshll.u32 %s119_s18, 4  ;;  %s679_s24 = smov [#allocation2 + $0x5]  }
  0x77   : > { %s121_s23 = scalar_lea.hbm %s926_s1, %s341_s11  ;;  %s148_s3 = sshll.u32 %s679_s24, 4  ;;  %s149_s3 = int_to_ptr.vmem [resolvable:$true] %s148_s3 }
  0x78   : > { %s503_s12 = scalar_lea.hbm %s121_s23, 16  ;;  %p506_p12 = scmp.lt.u32.totalorder %s121_s23, %s926_s1 }
  0x79   : > { %p504_p11 = scmp.ne.s32.totalorder %s121_s23, %s503_s12  ;;  %p507_p13 = scmp.lt.u32.totalorder %s772_s0, %s503_s12 }
  0x7a   : > { %p509_p1 = scmp.lt.u32.totalorder %s503_s12, %s121_s23 }
  0x7b   : > { %p508_p0 = por %p507_p13, %p506_p12 }
  0x7d   : > { %p510_p2 = por %p509_p1, %p508_p0 }
  0x7f   : > { %p511_p3 = pnand %p510_p2, %p504_p11 }
  0x81   : > { %514 = shalt.err (!%p511_p3)  }
  0x82   : > { %s515_s17 = scalar_lea.vmem %s823_s15, 16  ;;  %p520_p5 = scmp.lt.s32.totalorder %s823_s15, %s757_s5 }
  0x83   : > { %p516_p4 = scmp.ne.s32.totalorder %s823_s15, %s515_s17  ;;  %p521_p6 = scmp.lt.s32.totalorder %s781_s4, %s515_s17 }
  0x85   : > { %p522_p8 = por %p521_p6, %p520_p5 }
  0x87   : > { %p523_p10 = pnand %p522_p8, %p516_p4 }
  0x89   : > { %526 = shalt.err (!%p523_p10)  }
  0x8a   : > { %134 = dma.hbm_to_vmem [thread:$0]  %s121_s23, 16, %s823_s15, [#allocation3 + $0x4] }
  0x8b   : > { %s152_s18 = sadd.s32 6, %s749_s29  ;;  %s342_s13 = sshll.u32 %s828_s16, 4 }
  0x8c   : > { %s153_s6 = sld [smem:[#allocation5 + %s152_s18]]  ;;  %s138_s14 = scalar_lea.hbm %s926_s1, %s342_s13 }
  0x8d   : > { %s527_s7 = scalar_lea.hbm %s138_s14, 16  ;;  %p530_p12 = scmp.lt.u32.totalorder %s138_s14, %s926_s1 }
  0x8e   : > { %p528_p11 = scmp.ne.s32.totalorder %s138_s14, %s527_s7  ;;  %p531_p13 = scmp.lt.u32.totalorder %s772_s0, %s527_s7 }
  0x8f   : > { %p533_p1 = scmp.lt.u32.totalorder %s527_s7, %s138_s14 }
  0x90   : > { %p532_p0 = por %p531_p13, %p530_p12 }
  0x92   : > { %p534_p2 = por %p533_p1, %p532_p0 }
  0x94   : > { %p535_p3 = pnand %p534_p2, %p528_p11 }
  0x96   : > { %538 = shalt.err (!%p535_p3)  }
  0x97   : > { %s539_s15 = scalar_lea.vmem %s149_s3, 16  ;;  %p544_p5 = scmp.lt.s32.totalorder %s149_s3, %s757_s5 }
  0x98   : > { %p540_p4 = scmp.ne.s32.totalorder %s149_s3, %s539_s15  ;;  %p545_p6 = scmp.lt.s32.totalorder %s781_s4, %s539_s15 }
  0x9a   : > { %p546_p8 = por %p545_p6, %p544_p5 }
  0x9c   : > { %p547_p10 = pnand %p546_p8, %p540_p4 }
  0x9e   : > { %550 = shalt.err (!%p547_p10)  }
  0x9f   : > { %151 = dma.hbm_to_vmem [thread:$0]  %s138_s14, 16, %s149_s3, [#allocation3 + $0x5] }
  0xa0   : > { %s680_s16 = smov [#allocation2 + $0x6]   ;;  %s169_s10 = sadd.s32 7, %s749_s29 }
  0xa1   : > { %s165_s23 = sshll.u32 %s680_s16, 4  ;;  %s170_s9 = sld [smem:[#allocation5 + %s169_s10]]  ;;  %s166_s23 = int_to_ptr.vmem [resolvable:$true] %s165_s23 }
  0xa2   : > { %s343_s17 = sshll.u32 %s153_s6, 4  ;;  %s681_s18 = smov [#allocation2 + $0x7]  }
  0xa3   : > { %s182_s13 = sshll.u32 %s681_s18, 4  ;;  %s155_s7 = scalar_lea.hbm %s926_s1, %s343_s17  ;;  %s183_s13 = int_to_ptr.vmem [resolvable:$true] %s182_s13 }
  0xa4   : > { %s551_s24 = scalar_lea.hbm %s155_s7, 16  ;;  %p554_p12 = scmp.lt.u32.totalorder %s155_s7, %s926_s1 }
  0xa5   : > { %p552_p11 = scmp.ne.s32.totalorder %s155_s7, %s551_s24  ;;  %p555_p13 = scmp.lt.u32.totalorder %s772_s0, %s551_s24 }
  0xa6   : > { %p557_p1 = scmp.lt.u32.totalorder %s551_s24, %s155_s7 }
  0xa7   : > { %p556_p0 = por %p555_p13, %p554_p12 }
  0xa9   : > { %p558_p2 = por %p557_p1, %p556_p0 }
  0xab   : > { %p559_p3 = pnand %p558_p2, %p552_p11 }
  0xad   : > { %562 = shalt.err (!%p559_p3)  }
  0xae   : > { %s563_s29 = scalar_lea.vmem %s166_s23, 16  ;;  %p568_p5 = scmp.lt.s32.totalorder %s166_s23, %s757_s5 }
  0xaf   : > { %p564_p4 = scmp.ne.s32.totalorder %s166_s23, %s563_s29  ;;  %p569_p6 = scmp.lt.s32.totalorder %s781_s4, %s563_s29 }
  0xb1   : > { %p570_p8 = por %p569_p6, %p568_p5 }
  0xb3   : > { %p571_p10 = pnand %p570_p8, %p564_p4 }
  0xb5   : > { %574 = shalt.err (!%p571_p10)  }
  0xb6   : > { %168 = dma.hbm_to_vmem [thread:$0]  %s155_s7, 16, %s166_s23, [#allocation3 + $0x6] }
  0xb7   : > { %s344_s3 = sshll.u32 %s170_s9, 4 }
  0xb8   : > { %s172_s16 = scalar_lea.hbm %s926_s1, %s344_s3 }
  0xb9   : > { %s575_s10 = scalar_lea.hbm %s172_s16, 16  ;;  %p578_p12 = scmp.lt.u32.totalorder %s172_s16, %s926_s1 }
  0xba   : > { %p576_p11 = scmp.ne.s32.totalorder %s172_s16, %s575_s10  ;;  %p579_p13 = scmp.lt.u32.totalorder %s772_s0, %s575_s10 }
  0xbb   : > { %p581_p1 = scmp.lt.u32.totalorder %s575_s10, %s172_s16 }
  0xbc   : > { %p580_p0 = por %p579_p13, %p578_p12 }
  0xbe   : > { %p582_p2 = por %p581_p1, %p580_p0 }
  0xc0   : > { %p583_p3 = pnand %p582_p2, %p576_p11 }
  0xc2   : > { %586 = shalt.err (!%p583_p3)  }
  0xc3   : > { %s587_s23 = scalar_lea.vmem %s183_s13, 16  ;;  %p592_p5 = scmp.lt.s32.totalorder %s183_s13, %s757_s5 }
  0xc4   : > { %p588_p4 = scmp.ne.s32.totalorder %s183_s13, %s587_s23  ;;  %p593_p6 = scmp.lt.s32.totalorder %s781_s4, %s587_s23 }
  0xc6   : > { %p594_p8 = por %p593_p6, %p592_p5 }
  0xc8   : > { %p595_p10 = pnand %p594_p8, %p588_p4 }
  0xca   : > { %598 = shalt.err (!%p595_p10)  }
  0xcb   : > { %185 = dma.hbm_to_vmem [thread:$0]  %s172_s16, 16, %s183_s13, [#allocation3 + $0x7] }
  0xcc   : > { %s51_s9 = scalar_lea.vmem [#allocation6], %s753_s30 }
  0xcd   : > { %641 = dma.done.wait [#allocation3], 16 }
  0xce   : > { %642 = vsyncadd [#allocation3], 4294967280 }
  0xcf   : > { %643 = dma.done.wait [#allocation3 + $0x1], 16 }
  0xd0   : > { %644 = vsyncadd [#allocation3 + $0x1], 4294967280 }
  0xd1   : > { %645 = dma.done.wait [#allocation3 + $0x2], 16 }
  0xd2   : > { %646 = vsyncadd [#allocation3 + $0x2], 4294967280 }
  0xd3   : > { %647 = dma.done.wait [#allocation3 + $0x3], 16 }
  0xd4   : > { %648 = vsyncadd [#allocation3 + $0x3], 4294967280 }
  0xd5   : > { %649 = dma.done.wait [#allocation3 + $0x4], 16 }
  0xd6   : > { %650 = vsyncadd [#allocation3 + $0x4], 4294967280 }
  0xd7   : > { %651 = dma.done.wait [#allocation3 + $0x5], 16 }
  0xd8   : > { %652 = vsyncadd [#allocation3 + $0x5], 4294967280 }
  0xd9   : > { %653 = dma.done.wait [#allocation3 + $0x6], 16 }
  0xda   : > { %654 = vsyncadd [#allocation3 + $0x6], 4294967280 }
  0xdb   : > { %655 = dma.done.wait [#allocation3 + $0x7], 16 }
  0xdc   : > { %656 = vsyncadd [#allocation3 + $0x7], 4294967280  ;;  %s346_s30 = sshll.u32 %s671_s21, 7  ;;  %s218_s5 = sshll.u32 %s51_s9, 4  ;;  %v202_v0 = vld [vmem:[#allocation2] sm:$0xff]  ;;  %s886_s5 = int_to_ptr.vmem [resolvable:$true] %s218_s5 }
  0xdd   : > { %s884_s13 = scalar_lea.hbm %s927_s2, %s346_s30  ;;  %203 = vst [vmem:[%s51_s9] sm:$0xff] %v202_v0  ;;  %s205_s8 = scalar_lea.sflag [#allocation7], %s49_s28 }
  0xde   : > { %s599_s11 = scalar_lea.vmem %s886_s5, 128  ;;  %s682_s7 = smov [#allocation6]  }
  0xdf   : > { %p600_p11 = scmp.ne.s32.totalorder %s886_s5, %s599_s11  ;;  %s603_s24 = sshll.u32 %s682_s7, 4  ;;  %s604_s24 = int_to_ptr.vmem [resolvable:$false] %s603_s24 }
  0xe0   : > { %s605_s12 = scalar_lea.vmem %s604_s24, 256  ;;  %p606_p0 = scmp.lt.s32.totalorder %s886_s5, %s604_s24 }
  0xe1   : > { %p601_p12 = pnand %p600_p11, %p738_p7  ;;  %p607_p1 = scmp.lt.s32.totalorder %s605_s12, %s599_s11 }
  0xe3   : > { %p602_p13 = pneg %p601_p12  ;;  %p608_p2 = por %p607_p1, %p606_p0 }
  0xe5   : > { %p609_p3 = pnand %p608_p2, %p602_p13 }
  0xe7   : > { %612 = shalt.err (!%p609_p3)
}
  0xe8   : > { %s613_s28 = scalar_lea.hbm %s884_s13, 128  ;;  %s617_s3 = scalar_lea.hbm %s927_s2, 512 }
  0xe9   : > { %p614_p4 = scmp.ne.s32.totalorder %s884_s13, %s613_s28  ;;  %p618_p8 = scmp.lt.u32.totalorder %s884_s13, %s927_s2 }
  0xea   : > { %p619_p10 = scmp.lt.u32.totalorder %s617_s3, %s613_s28  ;;  %p621_p12 = scmp.lt.u32.totalorder %s613_s28, %s884_s13 }
  0xeb   : > { %p615_p5 = pnand %p614_p4, %p738_p7 }
  0xec   : > { %p620_p11 = por %p619_p10, %p618_p8 }
  0xed   : > { %p616_p6 = pneg %p615_p5 }
  0xee   : > { %p622_p13 = por %p621_p12, %p620_p11 }
  0xf0   : > { %p623_p0 = pnand %p622_p13, %p616_p6 }
  0xf2   : > { %626 = shalt.err (!%p623_p0)
}
  0xf3   : > { %357 = dma.vmem_to_hbm [thread:$0]  (%p738_p7), %s886_s5, 128, %s884_s13, %s205_s8  }
  0xf4 PF: > { %p363_p1 = scmp.ge.s32.totalorder %s671_s21, 1  ;;  %s230_s16 = sand.u32 1, %s663_s19  }
  0xf5   : > { %s231_s10 = scalar_lea.sflag [#allocation7], %s230_s16 }
  0xf6   : > { %p360_p2 = pnand %p363_p1, %p742_p9 }
  0xf8   : > { %658 = dma.done.wait (!%p360_p2), %s231_s10, 128  }
  0xf9   : > { %660 = vsyncadd (!%p360_p2), %s231_s10, 4294967168  ;;  %p16_p3 = scmp.ge.s32.totalorder %s727_s22, 5   ;;  %s930_s19 = smov %s667_s20 }
  0xfa   : > { %s931_s20 = smov %s736_s25  ;;  %s932_s21 = smov %s727_s22 }
  0xfb   :  { %18 = sbr.rel (!%p16_p3) target bundleno = 15 (0xf), region = 105 }
 0x102   :  { %236 = vsyncpa [#allocation7], 1 }
 0x103   :  { %238 = vsyncpa [#allocation7 + $0x1], 1 }
 0x104   :  { %239 = vsyncmov [#allocation3] }
 0x107   :  { %s240_s21 = vpop.sfrf %239 }
 0x108   :  { %p349_p7 = scmp.ne.s32.totalorder %s240_s21, 0 }
 0x10a   :  { %244 = shalt.err (%p349_p7)  }
 0x10b   :  { %246 = vsyncmov [#allocation3 + $0x1] }
 0x10e   :  { %s247_s26 = vpop.sfrf %246 }
 0x10f   :  { %p350_p9 = scmp.ne.s32.totalorder %s247_s26, 0 }
 0x111   :  { %251 = shalt.err (%p350_p9)  }
 0x112   :  { %253 = vsyncmov [#allocation3 + $0x2] }
 0x115   :  { %s254_s27 = vpop.sfrf %253 }
 0x116   :  { %p351_p4 = scmp.ne.s32.totalorder %s254_s27, 0 }
 0x118   :  { %258 = shalt.err (%p351_p4)  }
 0x119   :  { %260 = vsyncmov [#allocation3 + $0x3] }
 0x11c   :  { %s261_s17 = vpop.sfrf %260 }
 0x11d   :  { %p352_p5 = scmp.ne.s32.totalorder %s261_s17, 0 }
 0x11f   :  { %265 = shalt.err (%p352_p5)  }
 0x120   :  { %267 = vsyncmov [#allocation3 + $0x4] }
 0x123   :  { %s268_s22 = vpop.sfrf %267 }
 0x124   :  { %p353_p6 = scmp.ne.s32.totalorder %s268_s22, 0 }
 0x126   :  { %272 = shalt.err (%p353_p6)  }
 0x127   :  { %274 = vsyncmov [#allocation3 + $0x5] }
 0x12a   :  { %s275_s1 = vpop.sfrf %274 }
 0x12b   :  { %p354_p8 = scmp.ne.s32.totalorder %s275_s1, 0 }
 0x12d   :  { %279 = shalt.err (%p354_p8)  }
 0x12e   :  { %281 = vsyncmov [#allocation3 + $0x6] }
 0x131   :  { %s282_s2 = vpop.sfrf %281 }
 0x132   :  { %p355_p10 = scmp.ne.s32.totalorder %s282_s2, 0 }
 0x134   :  { %286 = shalt.err (%p355_p10)  }
 0x135   :  { %288 = vsyncmov [#allocation3 + $0x7] }
 0x138   :  { %s289_s19 = vpop.sfrf %288 }
 0x139   :  { %p356_p11 = scmp.ne.s32.totalorder %s289_s19, 0 }
 0x13b   :  { %293 = shalt.err (%p356_p11)  }

</bundles_post_ra>
